<compile_context>
chip_gen: v5e
topology: v5e:2x2
jax: 0.10.0
libtpu: 0.0.40
codegen_flags: <defaults>
</compile_context>

<pallas_src>
import functools
import math

import jax
import jax.numpy as jnp
from jax.experimental import pallas as pl
from jax.experimental.pallas import tpu as pltpu

_INV_SQRT2 = 1.0 / math.sqrt(2.0)
_TANH_GELU_C = 0.7978845608028654  # sqrt(2/pi)


def _round_up(n, m):
    return ((n + m - 1) // m) * m


def _cdiv(a, b):
    return (a + b - 1) // b


def _prenorm_residual_kernel(
    xc_ref,        # (TM, D + C)  rows of [x || context], stream dtype
    gamma_ref,     # (1, D + C)   LN gamma padded with ones over the ctx lanes
    beta_ref,      # (1, D + C)   LN beta  padded with zeros over the ctx lanes
    w_in_ref,      # (D + C, H)   [W1 ; Wc], matmul dtype
    b_in_ref,      # (1, H)       b1 + bc, f32
    w2_ref,        # (H, D)       W2, matmul dtype
    b2_ref,        # (1, D)       b2, f32
    o_ref,         # (TM, D)
    *,
    d_model,
    mxu_dtype,
    approx_gelu,
):
    xc = xc_ref[...].astype(jnp.float32)               # (TM, DC), f32 math
    tm, dc = xc.shape

    # --- LayerNorm over the first d_model lanes only (the x part) ----------
    # Cheap (1, DC) lane mask, broadcast inside the two selects below.
    is_x = jax.lax.broadcasted_iota(jnp.int32, (1, dc), 1) < d_model
    inv_d = 1.0 / float(d_model)

    x_masked = jnp.where(is_x, xc, 0.0)
    mean = jnp.sum(x_masked, axis=-1, keepdims=True) * inv_d
    centered = jnp.where(is_x, xc - mean, 0.0)
    var = jnp.sum(centered * centered, axis=-1, keepdims=True) * inv_d
    rstd = jax.lax.rsqrt(var + 1e-5)

    # gamma padded with 1 / beta padded with 0 over the ctx lanes and
    # `centered` is 0 there, so xn_full is 0 on ctx lanes; splice the raw ctx
    # values back with a single add (xc - x_masked keeps only the ctx lanes).
    xn_full = centered * rstd * gamma_ref[...] + beta_ref[...]
    mixed = xn_full + (xc - x_masked)      # [ LN(x) || ctx ]

    # --- fused fc1 + context projection (single MXU pass, K = D + C) -------
    h = jnp.dot(mixed.astype(mxu_dtype), w_in_ref[...],
                preferred_element_type=jnp.float32) + b_in_ref[...]

    # --- GELU ----------------------------------------------------------------
    if approx_gelu:
        # tanh form: the transcendental runs on the EUP slot (idle otherwise).
        inner = _TANH_GELU_C * (h + 0.044715 * (h * h * h))
        h = 0.5 * h * (1.0 + jnp.tanh(inner))
    else:
        # exact erf GELU (matches nn.GELU() default)
        h = 0.5 * h * (1.0 + jax.lax.erf(h * _INV_SQRT2))

    # (dropout = identity in eval mode)

    # --- fc2 + residual ------------------------------------------------------
    out = jnp.dot(h.astype(mxu_dtype), w2_ref[...],
                  preferred_element_type=jnp.float32) + b2_ref[...]

    o_ref[...] = (xc[:, :d_model] + out).astype(o_ref.dtype)


def prenorm_residual_block(x, context, params, *, row_tile=8192,
                           matmul_dtype=jnp.bfloat16, approx_gelu=False):
    """x: [B, S, D], context: [B, S, C]. Returns [B, S, D]."""
    B, S, D = x.shape
    C = context.shape[-1]
    H = params["w1"].shape[1]
    DC = D + C
    N = B * S
    f32 = jnp.float32

    # Token-major, feature-last; concatenate x||ctx so fc1 / context_layer
    # fuse into one contraction.  Stream activations in the matmul dtype
    # (bf16 default) -> halves the dominant HBM read.
    xc = jnp.concatenate(
        [x.reshape(N, D).astype(f32), context.reshape(N, C).astype(f32)],
        axis=-1).astype(matmul_dtype)

    # Row-tile selection:
    #   * capped at `row_tile` (large, to amortize per-grid-step overhead),
    #   * balanced across tiles (no half-empty padded tail tile),
    #   * at least 2 grid steps whenever N allows it, so the "parallel" row
    #     axis can be sharded across v7x's two TensorCores.
    max_tiles = max(1, _cdiv(N, 8))
    num_tiles = min(max(2, _cdiv(N, row_tile)), max_tiles)
    tm = _round_up(_cdiv(N, num_tiles), 8)
    grid_m = _cdiv(N, tm)
    n_pad = grid_m * tm
    if n_pad != N:
        # Padded rows are all-zero: LN on them gives rstd = 1/sqrt(eps) and
        # xn = beta (finite), and the rows are sliced away below — safe.
        xc = jnp.pad(xc, ((0, n_pad - N), (0, 0)))

    gamma = jnp.concatenate(
        [params["gamma"].astype(f32), jnp.ones((C,), f32)]).reshape(1, DC)
    beta = jnp.concatenate(
        [params["beta"].astype(f32), jnp.zeros((C,), f32)]).reshape(1, DC)
    w_in = jnp.concatenate(
        [params["w1"], params["wc"]], axis=0).astype(matmul_dtype)      # (DC, H)
    b_in = (params["b1"].astype(f32) + params["bc"].astype(f32)).reshape(1, H)
    w2 = params["w2"].astype(matmul_dtype)                              # (H, D)
    b2 = params["b2"].astype(f32).reshape(1, D)

    kernel = functools.partial(
        _prenorm_residual_kernel, d_model=D, mxu_dtype=matmul_dtype,
        approx_gelu=approx_gelu)

    # Constant-index blocks: weights/biases stay VMEM-resident, never re-DMA'd.
    full = lambda shape: pl.BlockSpec(shape, lambda i: (0, 0))

    out = pl.pallas_call(
        kernel,
        out_shape=jax.ShapeDtypeStruct((n_pad, D), x.dtype),
        grid_spec=pltpu.PrefetchScalarGridSpec(
            num_scalar_prefetch=0,
            grid=(grid_m,),
            in_specs=[
                pl.BlockSpec((tm, DC), lambda i: (i, 0)),   # [x || ctx] rows
                full((1, DC)),                              # gamma (padded)
                full((1, DC)),                              # beta  (padded)
                full((DC, H)),                              # [W1 ; Wc]
                full((1, H)),                               # b1 + bc
                full((H, D)),                               # W2
                full((1, D)),                               # b2
            ],
            out_specs=pl.BlockSpec((tm, D), lambda i: (i, 0)),
        ),
        compiler_params=pltpu.CompilerParams(
            dimension_semantics=("parallel",),
        ),
    )(xc, gamma, beta, w_in, b_in, w2, b2)

    return out[:N].reshape(B, S, D)


def init_params(key, input_dim, hidden_dim, output_dim, context_dim,
                dtype=jnp.float32):
    ks = jax.random.split(key, 3)

    def lin(k, fan_in, fan_out):
        bound = 1.0 / math.sqrt(fan_in)
        kw, kb = jax.random.split(k)
        w = jax.random.uniform(kw, (fan_in, fan_out), dtype, -bound, bound)
        b = jax.random.uniform(kb, (fan_out,), dtype, -bound, bound)
        return w, b

    w1, b1 = lin(ks[0], input_dim, hidden_dim)
    wc, bc = lin(ks[1], context_dim, hidden_dim)
    w2, b2 = lin(ks[2], hidden_dim, output_dim)
    return {
        "gamma": jnp.ones((input_dim,), dtype),
        "beta": jnp.zeros((input_dim,), dtype),
        "w1": w1, "b1": b1,
        "wc": wc, "bc": bc,
        "w2": w2, "b2": b2,
    }


def _reference(x, context, p):
    """Pure-JAX mirror of the PyTorch module (eval mode), f32 math."""
    xf = x.astype(jnp.float32)
    mean = jnp.mean(xf, axis=-1, keepdims=True)
    var = jnp.mean((xf - mean) ** 2, axis=-1, keepdims=True)
    xn = (xf - mean) / jnp.sqrt(var + 1e-5) * p["gamma"] + p["beta"]
    h = xn @ p["w1"] + p["b1"]
    h = h + context.astype(jnp.float32) @ p["wc"] + p["bc"]
    h = 0.5 * h * (1.0 + jax.lax.erf(h * _INV_SQRT2))
    out = h @ p["w2"] + p["b2"]
    return (xf + out).astype(x.dtype)


if __name__ == "__main__":
    B, S = 2, 8
    INPUT_DIM = 32      # == OUTPUT_DIM (required by the residual add)
    HIDDEN_DIM = 64
    CONTEXT_DIM = 16

    key = jax.random.PRNGKey(0)
    kx, kc, kp = jax.random.split(key, 3)

    x = jax.random.normal(kx, (B, S, INPUT_DIM), jnp.float32)
    context = jax.random.normal(kc, (B, S, CONTEXT_DIM), jnp.float32)
    params = init_params(kp, INPUT_DIM, HIDDEN_DIM, INPUT_DIM, CONTEXT_DIM)

    ref = _reference(x, context, params)

    # Exact-math path (f32 stream + f32 MXU operands): tight tolerance.
    out_f32 = jax.block_until_ready(
        prenorm_residual_block(x, context, params, matmul_dtype=jnp.float32))
    assert out_f32.shape == (B, S, INPUT_DIM)
    assert jnp.allclose(out_f32, ref, atol=1e-4, rtol=1e-4), \
        "f32 kernel mismatch vs. JAX reference"

    # Performance path (bf16 activation stream + bf16 MXU, f32 accumulation).
    out_bf16 = jax.block_until_ready(
        prenorm_residual_block(x, context, params, matmul_dtype=jnp.bfloat16))
    assert jnp.allclose(out_bf16, ref, atol=5e-2, rtol=5e-2), \
        "bf16-operand kernel mismatch vs. JAX reference"

    # tanh-approximate GELU path (EUP) — gated behind a flag, looser tolerance.
    out_tanh = jax.block_until_ready(
        prenorm_residual_block(x, context, params, matmul_dtype=jnp.float32,
                               approx_gelu=True))
    assert jnp.allclose(out_tanh, ref, atol=2e-2, rtol=2e-2), \
        "tanh-GELU kernel mismatch vs. JAX reference"

    # Multi-tile grid + padded, balanced tail (N = 150 is not a tile multiple).
    B2, S2 = 3, 50
    x2 = jax.random.normal(jax.random.PRNGKey(1), (B2, S2, INPUT_DIM), jnp.float32)
    c2 = jax.random.normal(jax.random.PRNGKey(2), (B2, S2, CONTEXT_DIM), jnp.float32)
    out2 = jax.block_until_ready(
        prenorm_residual_block(x2, c2, params, row_tile=64,
                               matmul_dtype=jnp.float32))
    assert jnp.allclose(out2, _reference(x2, c2, params), atol=1e-4, rtol=1e-4), \
        "tail-padded kernel mismatch vs. JAX reference"

    print("KERNEL_OK")
</pallas_src>

<mosaic_0001>
module attributes {stable_mosaic.version = 11 : i64} {
  func.func @_prenorm_residual_kernel(%arg0: i32, %arg1: memref<8x48xf32, #tpu.memory_space<vmem>>, %arg2: memref<1x48xf32, #tpu.memory_space<vmem>>, %arg3: memref<1x48xf32, #tpu.memory_space<vmem>>, %arg4: memref<48x64xf32, #tpu.memory_space<vmem>>, %arg5: memref<1x64xf32, #tpu.memory_space<vmem>>, %arg6: memref<64x32xf32, #tpu.memory_space<vmem>>, %arg7: memref<1x32xf32, #tpu.memory_space<vmem>>, %arg8: memref<8x32xf32, #tpu.memory_space<vmem>>) attributes {dimension_semantics = [#tpu.dimension_semantics<parallel>], iteration_bounds = array<i64: 2>, scalar_prefetch = 0 : i64, scratch_operands = 0 : i64, tpu.core_type = #tpu.core_type<tc>, window_params = [{transform_indices = @transform_0, window_bounds = array<i64: 8, 48>}, {pipeline_mode = #tpu.pipeline_mode<synchronous>, transform_indices = @transform_1, window_bounds = array<i64: 1, 48>}, {pipeline_mode = #tpu.pipeline_mode<synchronous>, transform_indices = @transform_2, window_bounds = array<i64: 1, 48>}, {pipeline_mode = #tpu.pipeline_mode<synchronous>, transform_indices = @transform_3, window_bounds = array<i64: 48, 64>}, {pipeline_mode = #tpu.pipeline_mode<synchronous>, transform_indices = @transform_4, window_bounds = array<i64: 1, 64>}, {pipeline_mode = #tpu.pipeline_mode<synchronous>, transform_indices = @transform_5, window_bounds = array<i64: 64, 32>}, {pipeline_mode = #tpu.pipeline_mode<synchronous>, transform_indices = @transform_6, window_bounds = array<i64: 1, 32>}, {transform_indices = @transform_7, window_bounds = array<i64: 8, 32>}]} {
    %c0 = arith.constant 0 : index
    %c0_0 = arith.constant 0 : index
    %0 = vector.load %arg1[%c0, %c0_0] : memref<8x48xf32, #tpu.memory_space<vmem>>, vector<8x48xf32>
    %1 = tpu.iota {dimensions = array<i32: 1>} : vector<1x48xi32>
    %c32_i32 = arith.constant 32 : i32
    %2 = vector.broadcast %c32_i32 : i32 to vector<1x48xi32>
    %3 = arith.cmpi slt, %1, %2 : vector<1x48xi32>
    %cst = arith.constant 0.000000e+00 : f32
    %4 = vector.shape_cast %3 : vector<1x48xi1> to vector<1x48xi1>
    %5 = vector.broadcast %4 : vector<1x48xi1> to vector<8x48xi1>
    %6 = vector.broadcast %cst : f32 to vector<8x48xf32>
    %7 = arith.select %5, %0, %6 : vector<8x48xi1>, vector<8x48xf32>
    %cst_1 = arith.constant dense<0.000000e+00> : vector<8xf32>
    %8 = vector.multi_reduction <add>, %7, %cst_1 [1] : vector<8x48xf32> to vector<8xf32>
    %9 = vector.shape_cast %8 : vector<8xf32> to vector<8x1xf32>
    %cst_2 = arith.constant 3.125000e-02 : f32
    %10 = vector.broadcast %cst_2 : f32 to vector<8x1xf32>
    %11 = arith.mulf %9, %10 : vector<8x1xf32>
    %12 = vector.broadcast %11 : vector<8x1xf32> to vector<8x48xf32>
    %13 = arith.subf %0, %12 : vector<8x48xf32>
    %cst_3 = arith.constant 0.000000e+00 : f32
    %14 = vector.shape_cast %3 : vector<1x48xi1> to vector<1x48xi1>
    %15 = vector.broadcast %14 : vector<1x48xi1> to vector<8x48xi1>
    %16 = vector.broadcast %cst_3 : f32 to vector<8x48xf32>
    %17 = arith.select %15, %13, %16 : vector<8x48xi1>, vector<8x48xf32>
    %18 = arith.mulf %17, %17 : vector<8x48xf32>
    %cst_4 = arith.constant dense<0.000000e+00> : vector<8xf32>
    %19 = vector.multi_reduction <add>, %18, %cst_4 [1] : vector<8x48xf32> to vector<8xf32>
    %20 = vector.shape_cast %19 : vector<8xf32> to vector<8x1xf32>
    %cst_5 = arith.constant 3.125000e-02 : f32
    %21 = vector.broadcast %cst_5 : f32 to vector<8x1xf32>
    %22 = arith.mulf %20, %21 : vector<8x1xf32>
    %cst_6 = arith.constant 9.99999974E-6 : f32
    %23 = vector.broadcast %cst_6 : f32 to vector<8x1xf32>
    %24 = arith.addf %22, %23 : vector<8x1xf32>
    %25 = math.rsqrt %24 : vector<8x1xf32>
    %26 = vector.broadcast %25 : vector<8x1xf32> to vector<8x48xf32>
    %27 = arith.mulf %17, %26 : vector<8x48xf32>
    %c0_7 = arith.constant 0 : index
    %c0_8 = arith.constant 0 : index
    %28 = vector.load %arg2[%c0_7, %c0_8] : memref<1x48xf32, #tpu.memory_space<vmem>>, vector<1x48xf32>
    %29 = vector.broadcast %28 : vector<1x48xf32> to vector<8x48xf32>
    %30 = arith.mulf %27, %29 : vector<8x48xf32>
    %c0_9 = arith.constant 0 : index
    %c0_10 = arith.constant 0 : index
    %31 = vector.load %arg3[%c0_9, %c0_10] : memref<1x48xf32, #tpu.memory_space<vmem>>, vector<1x48xf32>
    %32 = vector.broadcast %31 : vector<1x48xf32> to vector<8x48xf32>
    %33 = arith.addf %30, %32 : vector<8x48xf32>
    %34 = arith.subf %0, %7 : vector<8x48xf32>
    %35 = arith.addf %33, %34 : vector<8x48xf32>
    %c0_11 = arith.constant 0 : index
    %c0_12 = arith.constant 0 : index
    %36 = vector.load %arg4[%c0_11, %c0_12] : memref<48x64xf32, #tpu.memory_space<vmem>>, vector<48x64xf32>
    %cst_13 = arith.constant dense<0.000000e+00> : vector<8x64xf32>
    %37 = tpu.matmul %35, %36, %cst_13 {dimension_numbers = #tpu.dot_dimension_numbers<[1], [0], [0], [1], [0, 0, 1, 1], [], []>} : vector<8x48xf32>, vector<48x64xf32>, vector<8x64xf32> -> vector<8x64xf32>
    %c0_14 = arith.constant 0 : index
    %c0_15 = arith.constant 0 : index
    %38 = vector.load %arg5[%c0_14, %c0_15] : memref<1x64xf32, #tpu.memory_space<vmem>>, vector<1x64xf32>
    %39 = vector.broadcast %38 : vector<1x64xf32> to vector<8x64xf32>
    %40 = arith.addf %37, %39 : vector<8x64xf32>
    %cst_16 = arith.constant 5.000000e-01 : f32
    %41 = vector.broadcast %cst_16 : f32 to vector<8x64xf32>
    %42 = arith.mulf %41, %40 : vector<8x64xf32>
    %cst_17 = arith.constant 0.707106769 : f32
    %43 = vector.broadcast %cst_17 : f32 to vector<8x64xf32>
    %44 = arith.mulf %40, %43 : vector<8x64xf32>
    %45 = math.erf %44 : vector<8x64xf32>
    %cst_18 = arith.constant 1.000000e+00 : f32
    %46 = vector.broadcast %cst_18 : f32 to vector<8x64xf32>
    %47 = arith.addf %46, %45 : vector<8x64xf32>
    %48 = arith.mulf %42, %47 : vector<8x64xf32>
    %c0_19 = arith.constant 0 : index
    %c0_20 = arith.constant 0 : index
    %49 = vector.load %arg6[%c0_19, %c0_20] : memref<64x32xf32, #tpu.memory_space<vmem>>, vector<64x32xf32>
    %cst_21 = arith.constant dense<0.000000e+00> : vector<8x32xf32>
    %50 = tpu.matmul %48, %49, %cst_21 {dimension_numbers = #tpu.dot_dimension_numbers<[1], [0], [0], [1], [0, 0, 1, 1], [], []>} : vector<8x64xf32>, vector<64x32xf32>, vector<8x32xf32> -> vector<8x32xf32>
    %c0_22 = arith.constant 0 : index
    %c0_23 = arith.constant 0 : index
    %51 = vector.load %arg7[%c0_22, %c0_23] : memref<1x32xf32, #tpu.memory_space<vmem>>, vector<1x32xf32>
    %52 = vector.broadcast %51 : vector<1x32xf32> to vector<8x32xf32>
    %53 = arith.addf %50, %52 : vector<8x32xf32>
    %54 = vector.extract_strided_slice %0 {offsets = [0, 0], sizes = [8, 32], strides = [1, 1]} : vector<8x48xf32> to vector<8x32xf32>
    %55 = arith.addf %54, %53 : vector<8x32xf32>
    %c0_24 = arith.constant 0 : index
    %c0_25 = arith.constant 0 : index
    %56 = vector.load %arg8[%c0_24, %c0_25] : memref<8x32xf32, #tpu.memory_space<vmem>>, vector<8x32xf32>
    tpu.vector_store %arg8[%c0_24, %c0_25], %55 {strides = array<i32>} : memref<8x32xf32, #tpu.memory_space<vmem>>, vector<8x32xf32>,
    return
  }
  func.func @transform_0(%arg0: i32) -> (i32, i32) {
    %c0_i32 = arith.constant 0 : i32
    %c0_i32_0 = arith.constant 0 : i32
    return %arg0, %c0_i32 : i32, i32
  }
  func.func @transform_1(%arg0: i32) -> (i32, i32) {
    %c0_i32 = arith.constant 0 : i32
    %c0_i32_0 = arith.constant 0 : i32
    %c0_i32_1 = arith.constant 0 : i32
    return %c0_i32, %c0_i32_0 : i32, i32
  }
  func.func @transform_2(%arg0: i32) -> (i32, i32) {
    %c0_i32 = arith.constant 0 : i32
    %c0_i32_0 = arith.constant 0 : i32
    %c0_i32_1 = arith.constant 0 : i32
    return %c0_i32, %c0_i32_0 : i32, i32
  }
  func.func @transform_3(%arg0: i32) -> (i32, i32) {
    %c0_i32 = arith.constant 0 : i32
    %c0_i32_0 = arith.constant 0 : i32
    %c0_i32_1 = arith.constant 0 : i32
    return %c0_i32, %c0_i32_0 : i32, i32
  }
  func.func @transform_4(%arg0: i32) -> (i32, i32) {
    %c0_i32 = arith.constant 0 : i32
    %c0_i32_0 = arith.constant 0 : i32
    %c0_i32_1 = arith.constant 0 : i32
    return %c0_i32, %c0_i32_0 : i32, i32
  }
  func.func @transform_5(%arg0: i32) -> (i32, i32) {
    %c0_i32 = arith.constant 0 : i32
    %c0_i32_0 = arith.constant 0 : i32
    %c0_i32_1 = arith.constant 0 : i32
    return %c0_i32, %c0_i32_0 : i32, i32
  }
  func.func @transform_6(%arg0: i32) -> (i32, i32) {
    %c0_i32 = arith.constant 0 : i32
    %c0_i32_0 = arith.constant 0 : i32
    %c0_i32_1 = arith.constant 0 : i32
    return %c0_i32, %c0_i32_0 : i32, i32
  }
  func.func @transform_7(%arg0: i32) -> (i32, i32) {
    %c0_i32 = arith.constant 0 : i32
    %c0_i32_0 = arith.constant 0 : i32
    return %arg0, %c0_i32 : i32, i32
  }
}

</mosaic_0001>

<bundles_post_ra>
// kernel: tpu_custom_call.1
= control target key start
LH: loop header
LB: loop body
LE: loop exit
PB: predicated region body
PF: predicated region fallthrough
CT: control target
= control target key end

     0   :  { %12 = vsyncpa [#allocation3], 0  ;;  %s820_s0 = inlined_call_operand.vmem [shape: f32[16,48], index: 0, kind: input, shape index: {}]   ;;  %s821_s1 = inlined_call_operand.vmem [shape: f32[1,48], index: 1, kind: input, shape index: {}]   ;;  %s822_s2 = inlined_call_operand.vmem [shape: f32[1,48], index: 2, kind: input, shape index: {}]   ;;  %s823_s3 = inlined_call_operand.vmem [shape: f32[48,64], index: 3, kind: input, shape index: {}]   ;;  %s824_s4 = inlined_call_operand.vmem [shape: f32[1,64], index: 4, kind: input, shape index: {}]   ;;  %s825_s5 = inlined_call_operand.vmem [shape: f32[64,32], index: 5, kind: input, shape index: {}]   ;;  %s826_s6 = inlined_call_operand.vmem [shape: f32[1,32], index: 6, kind: input, shape index: {}]   ;;  %s827_s7 = inlined_call_operand.hbm [shape: f32[16,32], index: 7, kind: output, shape index: {}]  }
   0x1   :  { %14 = vsyncpa [#allocation3 + $0x1], 0  ;;  %s672_s24 = smov 0   ;;  %s674_s25 = smov 0  }
   0x2   :  { %s676_s26 = smov 0   ;;  %s678_s27 = smov 0  }
   0x3 LB: > { %s693_s28 = sadd.s32 4294967295, %s630_s27   ;;  %s508_s29 = sadd.s32 4294967294, %s630_s27   ;;  %s630_s27 = sphi %s678_s27, %s833_s27   ;;  %s626_s26 = sphi %s676_s26, %s832_s26   ;;  %s622_s25 = sphi %s674_s25, %s831_s25   ;;  %s618_s24 = sphi %s672_s24, %s830_s24  }
   0x4   : > { %s697_s30 = sadd.s32 1, %s630_s27   ;;  %s179_s8 = sadd.s32 1, %s626_s26 }
   0x5   : > { %s176_s9 = ssub.s32 %s630_s27, %s697_s30  ;;  %p189_p0 = scmp.ne.s32.totalorder %s626_s26, %s622_s25 }
   0x6   : > { %p177_p1 = scmp.eq.s32.totalorder %s176_s9, 0  ;;  %p190_p2 = scmp.eq.s32.totalorder %s693_s28, 1 }
   0x7   : > { %p195_p3 = scmp.ne.s32.totalorder %s622_s25, %s618_s24  ;;  %p196_p4 = scmp.eq.s32.totalorder %s508_s29, 1 }
   0x8   : > { %s708_s10 = scalar_select %p177_p1, %s626_s26, %s179_s8  }
   0x9   : > { %p710_p5 = por %p190_p2, %p189_p0  ;;  %p714_p6 = por %p196_p4, %p195_p3 }
   0xa   : > { %p511_p7 = scmp.ge.s32.totalorder %s630_s27, 1  ;;  %p239_p8 = scmp.lt.s32.totalorder %s630_s27, 3 }
   0xc   : > { %p240_p9 = pnand %p511_p7, %p239_p8 }
   0xd   : > { %p270_p10 = scmp.lt.s32.totalorder (!%p240_p9), %s693_s28, 1  ;;  %s267_s29 = sand.u32 (!%p240_p9), 1, %s622_s25  }
   0xe   : > { %243 = sbr.rel (%p240_p9) target bundleno = 608 (0x260), region = 48  ;;  %s512_s8 = sshll.u32 (!%p240_p9), %s267_s29, 3 }
   0xf   : > { %s518_s9 = sshll.u32 (!%p240_p9), %s693_s28, 3  ;;  %s269_s18 = scalar_lea.vmem (!%p240_p9), [#allocation2], %s512_s8 }
  0x10   : > { %s446_s19 = sshll.u32 (!%p240_p9), %s269_s18, 4  ;;  %s588_s8 = scalar_lea.hbm (!%p240_p9), %s827_s7, 16  ;;  %s447_s19 = int_to_ptr.vmem [resolvable:$true] %s446_s19 }
  0x13   : > { %v275_v0 = vlaneseq  ;;  %s271_s13 = scalar_select %p270_p10, %s693_s28, 1  ;;  %vm281_vm1 = vcmask 392192   ;;  %v322_v11 = vld [vmem:[%s823_s3 + $0x28] sm:$0xff]  ;;  %v321_v12 = vld [vmem:[%s823_s3 + $0x20] sm:$0xff]  ;;  %v320_v13 = vld [vmem:[%s823_s3 + $0x18] sm:$0xff]  ;;  %vm406_vm9 = vcmask 523264  }
  0x14   : > { %340 = vmatpush.msra.mxu0 %v322_v11  ;;  %v319_v14 = vld [vmem:[%s823_s3 + $0x10] sm:$0xff]  ;;  %v318_v15 = vld [vmem:[%s823_s3 + $0x8] sm:$0xff]  ;;  %v317_v16 = vld [vmem:[%s823_s3] sm:$0xff]  ;;  %vm431_vm10 = vcmask 261120   ;;  %s434_s28 = scalar_lea.sflag [#allocation3], %s267_s29 }
  0x15   : > { %v276_v1 = vand.u32 127, %v275_v0  ;;  %s513_s14 = sshll.u32 %s271_s13, 3  ;;  %v560_v26 = vld [vmem:[%s821_s1] ss:$0 sm:$0xff]  ;;  %v401_v40 = vld [vmem:[%s825_s5 + $0x38] sm:$0xff]  ;;  %v400_v43 = vld [vmem:[%s825_s5 + $0x30] sm:$0xff] }
  0x16   : > { %s273_s17 = scalar_lea.vmem %s820_s0, %s513_s14  ;;  %341 = vmatpush.msra.mxu0 %v321_v12  ;;  %v561_v29 = vld [vmem:[%s822_s2] ss:$0 sm:$0xff]  ;;  %418 = vmatpush.msra.mxu1 %v401_v40  ;;  %v399_v46 = vld [vmem:[%s825_s5 + $0x28] sm:$0xff]  ;;  %v397_v50 = vld [vmem:[%s825_s5 + $0x18] sm:$0xff] }
  0x17   : > { %vm277_vm0 = vcmp.lt.s32.totalorder %v276_v1, 32  ;;  %v725_v2 = vld [vmem:[%s273_s17] sm:$0xff]  ;;  %v396_v52 = vld [vmem:[%s825_s5 + $0x10] sm:$0xff]  ;;  %v395_v55 = vld [vmem:[%s825_s5 + $0x8] sm:$0xff]  ;;  %s444_s17 = scalar_lea.hbm %s827_s7, %s518_s9 }
  0x18   : > { %v280_v3 = vsel %vm277_vm0, %v725_v2, 0.0  ;;  %342 = vmatpush.msra.mxu0 %v320_v13  ;;  %v562_v34 = vld [vmem:[%s824_s4] ss:$0 sm:$0xff]  ;;  %419 = vmatpush.msra.mxu1 %v400_v43  ;;  %s448_s20 = sshll.u32 %s444_s17, 4  ;;  %s449_s20 = int_to_ptr.hbm [resolvable:$true] %s448_s20 }
  0x19   : > { %v282_v4 = vsel %vm281_vm1, %v280_v3, 0.0  ;;  %v315_v30 = vsub.f32 %v725_v2, %v280_v3  ;;  %v398_v49 = vld [vmem:[%s825_s5 + $0x20] sm:$0xff]  ;;  %s582_s21 = sshra.s32 %s449_s20, 4  ;;  %s583_s21 = int_to_ptr.hbm [resolvable:$true] %s582_s21 }
  0x1a   : > { %283 = vadd.xlane.f32.xlu0 %v282_v4  ;;  %343 = vmatpush.msra.mxu0 %v319_v14  ;;  %v394_v57 = vld [vmem:[%s825_s5] sm:$0xff]  ;;  %s584_s22 = scalar_lea.hbm %s583_s21, 8  ;;  %p589_p0 = scmp.lt.s32.totalorder %s583_s21, %s827_s7 }
  0x1b   : > { %420 = vmatpush.msra.mxu1 %v399_v46  ;;  %p585_p11 = scmp.ne.s32.totalorder %s583_s21, %s584_s22  ;;  %p590_p1 = scmp.lt.s32.totalorder %s588_s8, %s584_s22 }
  0x1c   : > { %344 = vmatpush.msra.mxu0 %v318_v15 }
  0x1d   : > { %421 = vmatpush.msra.mxu1 %v398_v49  ;;  %p586_p12 = pnand %p585_p11, %p710_p5  ;;  %p591_p2 = por %p590_p1, %p589_p0 }
  0x1e   : > { %345 = vmatpush.msra.mxu0 %v317_v16 }
  0x1f   : > { %422 = vmatpush.msra.mxu1 %v397_v50  ;;  %p587_p13 = pneg %p586_p12 }
  0x21   : > { %423 = vmatpush.msra.mxu1 %v396_v52  ;;  %p592_p3 = pnand %p591_p2, %p587_p13 }
  0x23   : > { %424 = vmatpush.msra.mxu1 %v395_v55 }
  0x25   : > { %425 = vmatpush.msra.mxu1 %v394_v57 }
  0x8d   : > { %v284_v5 = vpop.xlane.xlu0 %283 }
  0x8e   : > { %v285_v6 = vmul.f32 0.03125, %v284_v5 }
  0x90   : > { %v286_v7 = vsub.f32 %v725_v2, %v285_v6 }
  0x92   : > { %v287_v8 = vsel %vm277_vm0, %v286_v7, 0.0 }
  0x93   : > { %v288_v9 = vmul.f32 %v287_v8, %v287_v8 }
  0x95   : > { %v289_v10 = vsel %vm281_vm1, %v288_v9, 0.0 }
  0x96   : > { %290 = vadd.xlane.f32.xlu0 %v289_v10 }
 0x109   : > { %v291_v17 = vpop.xlane.xlu0 %290 }
 0x10a   : > { %v292_v18 = vmul.f32 0.03125, %v291_v17 }
 0x10c   : > { %v293_v19 = vadd.f32 1e-05, %v292_v18 }
 0x10e   : > { %564 = vrsqrt.f32 %v293_v19  ;;  %vm300_vm3 = vweird.f32 %v293_v19 }
 0x114   : > { %v565_v20 = vpop.eup %564 }
 0x115   : > { %v295_v21 = vmul.f32 %v565_v20, %v293_v19  ;;  %vm301_vm2 = vweird.f32 %v565_v20 }
 0x116   : > { %vm302_vm4 = vmor %vm300_vm3, %vm301_vm2 }
 0x117   : > { %v296_v22 = vmul.f32 %v565_v20, %v295_v21  ;;  %v563_v21 = vld [vmem:[%s826_s6] ss:$0 sm:$0xff] }
 0x119   : > { %v297_v23 = vmul.f32 0.5, %v296_v22 }
 0x11b   : > { %v298_v24 = vsub.f32 1.5, %v297_v23 }
 0x11d   : > { %v299_v25 = vmul.f32 %v565_v20, %v298_v24 }
 0x11f   : > { %v303_v27 = vsel %vm302_vm4, %v565_v20, %v299_v25 }
 0x120   : > { %v304_v28 = vmul.f32 %v303_v27, %v287_v8 }
 0x122   : > { %v309_v31 = vmul.f32 %v560_v26, %v304_v28 }
 0x124   : > { %v314_v32 = vadd.f32 %v561_v29, %v309_v31 }
 0x126   : > { %v316_v33 = vadd.f32 %v315_v30, %v314_v32 }
 0x128   : > { %514 = vmatmul.msk.f32.vlgmr.msra.gmra.mxu0 %vm281_vm1, %v316_v33 }
 0x1a5   : > { %v347_v35 = vpop.f32.mrf.mxu0 }
 0x1a6   : > { %v348_v36 = vadd.f32 %v562_v34, %v347_v35 }
 0x1a8   : > { %v351_v37 = vmul.f32 0.70710677, %v348_v36  ;;  %v350_v18 = vmul.f32 0.5, %v348_v36 }
 0x1aa   : > { %v352_v38 = vmul.f32 %v351_v37, %v351_v37 }
 0x1ac   : > { %v353_v39 = vmin.f32 %v352_v38, 16.0 }
 0x1ae   : > { %v354_v41 = vmul.f32 2.1237322e-06, %v353_v39  ;;  %v365_v42 = vmul.f32 3.8918573e-05, %v353_v39 }
 0x1b0   : > { %v355_v44 = vadd.f32 0.00028619796, %v354_v41  ;;  %v366_v45 = vadd.f32 0.001143296, %v365_v42 }
 0x1b2   : > { %v356_v47 = vmul.f32 %v355_v44, %v353_v39  ;;  %v367_v48 = vmul.f32 %v366_v45, %v353_v39 }
 0x1b4   : > { %v368_v51 = vadd.f32 0.014752088, %v367_v48  ;;  %v357_v53 = vadd.f32 0.0036580483, %v356_v47 }
 0x1b6   : > { %v369_v54 = vmul.f32 %v368_v51, %v353_v39  ;;  %v358_v58 = vmul.f32 %v357_v53, %v353_v39 }
 0x1b8   : > { %v370_v56 = vadd.f32 0.112945676, %v369_v54  ;;  %v359_v61 = vadd.f32 0.05243302, %v358_v58 }
 0x1ba   : > { %v371_v59 = vmul.f32 %v370_v56, %v353_v39  ;;  %v360_v0 = vmul.f32 %v359_v61, %v353_v39 }
 0x1bc   : > { %v372_v60 = vadd.f32 0.4994258, %v371_v59  ;;  %v361_v1 = vadd.f32 0.18741608, %v360_v0 }
 0x1be   : > { %v373_v62 = vmul.f32 %v372_v60, %v353_v39  ;;  %v362_v4 = vmul.f32 %v361_v1, %v353_v39 }
 0x1c0   : > { %v374_v63 = vadd.f32 1.0, %v373_v62  ;;  %v363_v8 = vadd.f32 1.1283791, %v362_v4 }
 0x1c2   : > { %566 = vrcp.f32 %v374_v63  ;;  %v386_v7 = vand.u32 2147483648, %v374_v63  ;;  %v384_v10 = vand.u32 2147483647, %v374_v63  ;;  %vm380_vm6 = vweird.f32 %v374_v63 }
 0x1c3   : > { %v364_v13 = vmul.f32 %v363_v8, %v351_v37 }
 0x1c4   : > { %v387_v12 = vor.u32 1.1754944e-38, %v386_v7  ;;  %vm385_vm8 = vcmp.eq.f32.partialorder %v384_v10, 8.507059e+37 }
 0x1c8   : > { %v567_v3 = vpop.eup %566 }
 0x1c9   : > { %v376_v5 = vmul.f32 %v567_v3, %v374_v63  ;;  %vm381_vm5 = vweird.f32 %v567_v3 }
 0x1ca   : > { %vm382_vm7 = vmor %vm380_vm6, %vm381_vm5 }
 0x1cb   : > { %v377_v6 = vsub.f32 1.0, %v376_v5 }
 0x1cd   : > { %v378_v9 = vmul.f32 %v567_v3, %v377_v6 }
 0x1cf   : > { %v379_v11 = vadd.f32 %v567_v3, %v378_v9 }
 0x1d1   : > { %v383_v14 = vsel %vm382_vm7, %v567_v3, %v379_v11 }
 0x1d2   : > { %v388_v15 = vsel %vm385_vm8, %v387_v12, %v383_v14 }
 0x1d3   : > { %v389_v16 = vmul.f32 %v388_v15, %v364_v13 }
 0x1d5   : > { %v515_v17 = vclamps-f32 %v389_v16, 1.0 }
 0x1d7   : > { %v392_v19 = vadd.f32 1.0, %v515_v17 }
 0x1d9   : > { %v393_v20 = vmul.f32 %v392_v19, %v350_v18 }
 0x1db   : > { %516 = vmatmul.msk.f32.vlgmr.msra.gmra.mxu1 %vm406_vm9, %v393_v20 }
 0x258   : > { %v427_v22 = vpop.f32.mrf.mxu1 }
 0x259   : > { %v428_v23 = vadd.f32 %v563_v21, %v427_v22 }
 0x25b   : > { %v430_v24 = vadd.f32 %v428_v23, %v725_v2 }
 0x25d   : > { %432 = vst.msk [vmem:[%s269_s18] sm:$0xff] %vm431_vm10, %v430_v24 }
 0x25e   : > { %595 = shalt.err (!%p592_p3)
}
 0x25f   : > { %521 = dma.vmem_to_hbm [thread:$0]  (%p710_p5), %s447_s19, 128, %s449_s20, %s434_s28  }
 0x260 PF: > { %p527_p4 = scmp.ge.s32.totalorder %s630_s27, 2  ;;  %s460_s29 = sand.u32 1, %s618_s24  }
 0x261   : > { %s461_s15 = scalar_lea.sflag [#allocation3], %s460_s29 }
 0x262   : > { %p524_p7 = pnand %p527_p4, %p714_p6 }
 0x264   : > { %p525_p8 = pneg %p524_p7 }
 0x266   : > { %613 = dma.done.wait (%p525_p8), %s461_s15, 128  }
 0x267   : > { %615 = vsyncadd (%p525_p8), %s461_s15, 4294967168  ;;  %p17_p9 = scmp.ge.s32.totalorder %s697_s30, 4   ;;  %s830_s24 = smov %s622_s25 }
 0x268   : > { %s831_s25 = smov %s626_s26  ;;  %s832_s26 = smov %s708_s10 }
 0x269   : > { %s833_s27 = smov %s697_s30  ;;  %19 = sbr.rel (!%p17_p9) target bundleno = 3 (0x3), region = 83 }
 0x26e   :  { %467 = vsyncpa [#allocation3], 1 }
 0x26f   :  { %469 = vsyncpa [#allocation3 + $0x1], 1 }

</bundles_post_ra>
